<compile_context>
chip_gen: v7x
topology: tpu7x:2x2x1
jax: 0.10.0
libtpu: 0.0.40
codegen_flags: <defaults>
</compile_context>

<pallas_src>
import functools

import jax
import jax.numpy as jnp
from jax.experimental import pallas as pl
from jax.experimental.pallas import tpu as pltpu


def _concat_kernel(sup_ref, qry_ref, o_ref):
    # sup_ref: (n_pair, dim0, F)      -- support rows x[0 : 2*n_support], resident
    # qry_ref: (TQ,     dim0, F)      -- TQ query rows for this grid step
    # o_ref:   (TQ*n_pair, dim0, 2F)  -- output block for these TQ queries
    n_pair, dim0, feat = sup_ref.shape
    tq = qry_ref.shape[0]

    sup_b = jnp.broadcast_to(sup_ref[...][None], (tq, n_pair, dim0, feat))
    qry_b = jnp.broadcast_to(qry_ref[...][:, None], (tq, n_pair, dim0, feat))

    blk = jnp.concatenate([sup_b, qry_b], axis=-1)        # (TQ, n_pair, dim0, 2F)
    # Leading-dim-only reshape (free, does not cross (8,128) tiles), then one
    # full-block, unmasked store.
    o_ref[...] = blk.reshape(tq * n_pair, dim0, 2 * feat)


def _pick_tq(nq: int, per_query_bytes: int, target_bytes: int) -> int:
    """Largest divisor of nq whose output block fits target_bytes, preferring
    to keep >= 2 grid steps (so both v7x TensorCores get work)."""
    divisors = [t for t in range(1, nq + 1) if nq % t == 0]
    feasible = [t for t in divisors if t * per_query_bytes <= target_bytes]
    if not feasible:
        return 1
    tq = max(feasible)
    two_step = [t for t in feasible if nq // t >= 2]
    if two_step:
        tq = max(two_step)
    return tq


def pallas_concat(x: jax.Array, n_support: int, n_query: int, n_class: int,
                  *, target_block_bytes: int = 4 << 20) -> jax.Array:
    """Pallas equivalent of Concat.forward for a 3-D input x of shape (N, dim0, F)."""
    if x.ndim != 3:
        raise ValueError("Concat.forward expects a 3-D input (N, dim0, F)")
    if n_class < 2:
        # The PyTorch code indexes x1[j] for j < n_support, which requires
        # (n_class - 1) * n_support >= n_support.
        raise ValueError("Concat semantics require n_class >= 2")

    n, dim0, feat = x.shape
    n_sq = n_class * n_support        # index where query rows start
    nq = n_class * n_query            # number of queries
    n_pair = 2 * n_support            # output rows emitted per query
    if n < n_sq + nq:
        raise ValueError("input has too few rows for the given (n_support, n_query, n_class)")

    # Pre-slice the queries so their block index is simply (qb, 0, 0).
    xq = x[n_sq:n_sq + nq]            # (nq, dim0, F)

    per_query_bytes = n_pair * dim0 * 2 * feat * x.dtype.itemsize
    tq = _pick_tq(nq, per_query_bytes, target_block_bytes)
    n_qb = nq // tq

    out_shape = jax.ShapeDtypeStruct((nq * n_pair, dim0, 2 * feat), x.dtype)

    return pl.pallas_call(
        _concat_kernel,
        out_shape=out_shape,
        grid_spec=pl.GridSpec(
            grid=(n_qb,),
            in_specs=[
                # support slab x[0 : 2*n_support] -- constant block index,
                # loaded once and kept resident in VMEM across all grid steps.
                pl.BlockSpec((n_pair, dim0, feat), lambda qb: (0, 0, 0)),
                # TQ query rows for this step
                pl.BlockSpec((tq, dim0, feat), lambda qb: (qb, 0, 0)),
            ],
            out_specs=pl.BlockSpec((tq * n_pair, dim0, 2 * feat),
                                   lambda qb: (qb, 0, 0)),
        ),
        compiler_params=pltpu.CompilerParams(
            dimension_semantics=("parallel",),       # query blocks are independent
            vmem_limit_bytes=32 * 1024 * 1024,       # headroom for big output blocks
        ),
    )(x, xq)


def _concat_reference(x, n_support, n_query, n_class):
    """Pure-JAX reference mirroring the PyTorch loop exactly."""
    x0 = x[:n_support]
    x1 = x[n_support:n_class * n_support]
    xq = x[n_class * n_support:]
    rows = []
    for i in range(n_class * n_query):
        for j in range(n_support):
            rows.append(jnp.concatenate([x0[j], xq[i]], axis=-1)[None])
        for j in range(n_support):
            rows.append(jnp.concatenate([x1[j], xq[i]], axis=-1)[None])
    return jnp.concatenate(rows, axis=0)


if __name__ == "__main__":
    key = jax.random.PRNGKey(0)

    # small shapes consistent with the module's forward:
    # x: (n_class*n_support + n_class*n_query, dim0, feat)
    # feat chosen as 128 so every half of the concat is vreg-lane aligned and
    # the full-block store is unmasked; dim0 a multiple of 8 for dense sublanes.
    n_support, n_query, n_class = 2, 2, 2
    dim0, feat = 16, 128
    n_total = n_class * n_support + n_class * n_query      # 8
    x = jax.random.normal(key, (n_total, dim0, feat), dtype=jnp.float32)

    y = pallas_concat(x, n_support, n_query, n_class)
    y = jax.block_until_ready(y)

    y_ref = _concat_reference(x, n_support, n_query, n_class)
    assert y.shape == y_ref.shape == (n_class * n_query * 2 * n_support, dim0, 2 * feat)
    assert y.dtype == x.dtype
    assert jnp.allclose(y, y_ref, atol=0.0, rtol=0.0)

    print("KERNEL_OK")
</pallas_src>

<mosaic_0001>
module attributes {stable_mosaic.version = 11 : i64} {
  func.func @_concat_kernel(%arg0: i32, %arg1: memref<4x16x128xf32, #tpu.memory_space<vmem>>, %arg2: memref<2x16x128xf32, #tpu.memory_space<vmem>>, %arg3: memref<8x16x256xf32, #tpu.memory_space<vmem>>) attributes {dimension_semantics = [#tpu.dimension_semantics<parallel>], iteration_bounds = array<i64: 2>, scalar_prefetch = 0 : i64, scratch_operands = 0 : i64, tpu.core_type = #tpu.core_type<tc>, window_params = [{transform_indices = @transform_0, window_bounds = array<i64: 4, 16, 128>}, {transform_indices = @transform_1, window_bounds = array<i64: 2, 16, 128>}, {transform_indices = @transform_2, window_bounds = array<i64: 8, 16, 256>}]} {
    %c0 = arith.constant 0 : index
    %c0_0 = arith.constant 0 : index
    %c0_1 = arith.constant 0 : index
    %0 = vector.load %arg1[%c0, %c0_0, %c0_1] : memref<4x16x128xf32, #tpu.memory_space<vmem>>, vector<4x16x128xf32>
    %1 = vector.shape_cast %0 : vector<4x16x128xf32> to vector<1x4x16x128xf32>
    %2 = vector.shape_cast %1 : vector<1x4x16x128xf32> to vector<1x4x16x128xf32>
    %3 = vector.broadcast %2 : vector<1x4x16x128xf32> to vector<2x4x16x128xf32>
    %c0_2 = arith.constant 0 : index
    %c0_3 = arith.constant 0 : index
    %c0_4 = arith.constant 0 : index
    %4 = vector.load %arg2[%c0_2, %c0_3, %c0_4] : memref<2x16x128xf32, #tpu.memory_space<vmem>>, vector<2x16x128xf32>
    %5 = vector.shape_cast %4 : vector<2x16x128xf32> to vector<2x1x16x128xf32>
    %6 = vector.shape_cast %5 : vector<2x1x16x128xf32> to vector<2x1x16x128xf32>
    %7 = vector.broadcast %6 : vector<2x1x16x128xf32> to vector<2x4x16x128xf32>
    %8 = tpu.concatenate %3, %7 in 3 : vector<2x4x16x128xf32>, vector<2x4x16x128xf32> -> vector<2x4x16x256xf32>
    %9 = vector.shape_cast %8 : vector<2x4x16x256xf32> to vector<8x16x256xf32>
    %c0_5 = arith.constant 0 : index
    %c0_6 = arith.constant 0 : index
    %c0_7 = arith.constant 0 : index
    %10 = vector.load %arg3[%c0_5, %c0_6, %c0_7] : memref<8x16x256xf32, #tpu.memory_space<vmem>>, vector<8x16x256xf32>
    tpu.vector_store %arg3[%c0_5, %c0_6, %c0_7], %9 {strides = array<i32>} : memref<8x16x256xf32, #tpu.memory_space<vmem>>, vector<8x16x256xf32>,
    return
  }
  func.func @transform_0(%arg0: i32) -> (i32, i32, i32) {
    %c0_i32 = arith.constant 0 : i32
    %c0_i32_0 = arith.constant 0 : i32
    %c0_i32_1 = arith.constant 0 : i32
    %c0_i32_2 = arith.constant 0 : i32
    return %c0_i32, %c0_i32_0, %c0_i32_1 : i32, i32, i32
  }
  func.func @transform_1(%arg0: i32) -> (i32, i32, i32) {
    %c0_i32 = arith.constant 0 : i32
    %c0_i32_0 = arith.constant 0 : i32
    %c0_i32_1 = arith.constant 0 : i32
    return %arg0, %c0_i32, %c0_i32_0 : i32, i32, i32
  }
  func.func @transform_2(%arg0: i32) -> (i32, i32, i32) {
    %c0_i32 = arith.constant 0 : i32
    %c0_i32_0 = arith.constant 0 : i32
    %c0_i32_1 = arith.constant 0 : i32
    return %arg0, %c0_i32, %c0_i32_0 : i32, i32, i32
  }
}

</mosaic_0001>

<bundles_post_ra>
// kernel: tpu_custom_call.1
= control target key start
LH: loop header
LB: loop body
LE: loop exit
PB: predicated region body
PF: predicated region fallthrough
CT: control target
= control target key end

     0   :  { %7 = vsyncpa [#allocation3], 0  ;;  %s813_s0 = inlined_call_operand.hbm [shape: f32[8,16,128], index: 0, kind: input, shape index: {}]   ;;  %s814_s1 = inlined_call_operand.hbm [shape: f32[4,16,128], index: 1, kind: input, shape index: {}]   ;;  %s815_s2 = inlined_call_operand.hbm [shape: f32[16,16,256], index: 2, kind: output, shape index: {}]  }
   0x1   :  { %8 = vsyncpa [#allocation6], 0 }
   0x2   :  { %10 = vsyncpa [#allocation6 + $0x1], 0 }
   0x3   :  { %11 = vsyncpa [#allocation4], 0 }
   0x4   :  { %13 = vsyncpa [#allocation4 + $0x1], 0  ;;  %s559_s9 = smov 0   ;;  %s561_s10 = smov 0  }
   0x5   :  { %s563_s11 = smov 0   ;;  %s565_s12 = smov 0  }
   0x6 LB: > { %s580_s13 = sadd.s32 4294967295, %s535_s12   ;;  %s324_s14 = sadd.s32 4294967294, %s535_s12   ;;  %s535_s12 = sphi %s565_s12, %s835_s12   ;;  %s531_s11 = sphi %s563_s11, %s834_s11   ;;  %s527_s10 = sphi %s561_s10, %s833_s10   ;;  %s523_s9 = sphi %s559_s9, %s832_s9  }
   0x7   : > { %p60_p0 = scmp.ne.s32.totalorder %s527_s10, %s523_s9  ;;  %p816_p1 = scmp.eq.s32.totalorder %s580_s13, 0 }
   0x8   : > { %p90_p3 = scmp.eq.s32.totalorder %s324_s14, 1  ;;  %p325_p5 = scmp.ge.s32.totalorder %s535_s12, 1 }
   0x9   : > { %p589_p4 = por %p816_p1, %p60_p0  ;;  %p97_p7 = scmp.lt.s32.totalorder %s535_s12, 3 }
   0xa   : > { %p594_p6 = por %p90_p3, %p60_p0  ;;  %s537_s18 = smov [#allocation2]  }
   0xb   : > { %s819_s15 = scalar_select %p589_p4, 1, 0 }
   0xc   : > { %s820_s16 = scalar_select %p594_p6, 1, 0 }
   0xd   : > { %p599_p8 = pnand %p325_p5, %p97_p7  ;;  %s109_s19 = sshll.u32 %s537_s18, 4  ;;  %s603_s19 = int_to_ptr.vmem [resolvable:$true] %s109_s19 }
   0xe   : > { %s615_s21 = sadd.s32 1, %s535_s12   ;;  %s47_s22 = sadd.s32 1, %s531_s11 }
   0xf   : > { %s821_s17 = scalar_select %p599_p8, 1, 0 }
  0x10   : > { %p354_p9 = pneg %p599_p8  ;;  %s44_s23 = ssub.s32 %s535_s12, %s615_s21 }
  0x11   : > { %s407_s26 = scalar_lea.hbm %s813_s0, 1024  ;;  %s412_s3 = scalar_lea.hbm %s813_s0, 2048 }
  0x12   : > { %p610_p11 = pnand %p354_p9, %p816_p1  ;;  %p408_p12 = scmp.ne.s32.totalorder %s813_s0, %s407_s26 }
  0x13   : > { %p413_p5 = scmp.lt.u32.totalorder %s412_s3, %s407_s26  ;;  %p414_p7 = scmp.lt.u32.totalorder %s407_s26, %s813_s0 }
  0x14   : > { %p409_p13 = pneg %p610_p11 }
  0x15   : > { %p415_p9 = por %p414_p7, %p413_p5 }
  0x16   : > { %p410_p0 = pnand %p409_p13, %p408_p12 }
  0x18   : > { %p411_p3 = pneg %p410_p0 }
  0x1a   : > { %p416_p10 = pnand %p415_p9, %p411_p3 }
  0x1c   : > { %419 = shalt.err (!%p416_p10)
}
  0x1d   : > { %s420_s6 = scalar_lea.vmem %s603_s19, 1024  ;;  %p428_p0 = scmp.lt.s32.totalorder %s603_s19, %s603_s19 }
  0x1e   : > { %p421_p1 = scmp.ne.s32.totalorder %s603_s19, %s420_s6  ;;  %p429_p6 = scmp.lt.s32.totalorder %s420_s6, %s420_s6 }
  0x20   : > { %p423_p2 = pnand %p421_p1, %p409_p13  ;;  %p430_p4 = por %p429_p6, %p428_p0 }
  0x22   : > { %p424_p12 = pneg %p423_p2 }
  0x24   : > { %p431_p8 = pnand %p430_p4, %p424_p12 }
  0x26   : > { %434 = shalt.err (!%p431_p8)
}
  0x27   : > { %s538_s7 = smov 128   ;;  %s539_s8 = smov 8  }
  0x28   : > { %357 = dma.hbm_to_vmem [thread:$0]  (!%p610_p11), %s813_s0, 1024, %s603_s19, [#allocation3], %s538_s7, %s538_s7, %s539_s8  }
  0x29   : > { %p45_p1 = scmp.eq.s32.totalorder %s44_s23, 0  ;;  %p54_p2 = scmp.ne.s32.totalorder %s531_s11, %s527_s10 }
  0x2a   : > { %p55_p4 = scmp.eq.s32.totalorder %s535_s12, 0  ;;  %p367_p6 = scmp.lt.s32.totalorder %s535_s12, 2 }
  0x2b   : > { %s654_s24 = scalar_select %p45_p1, %s531_s11, %s47_s22  }
  0x2c   : > { %p56_p8 = por %p55_p4, %p54_p2  ;;  %p823_p10 = scmp.eq.s32.totalorder %s580_s13, 1 }
  0x2d   : > { %s123_s20 = sand.u32 1, %s531_s11   ;;  %s343_s26 = sshll.u32 %s535_s12, 9 }
  0x2e   : > { %p658_p13 = por %p823_p10, %p54_p2  ;;  %s328_s27 = sshll.u32 %s123_s20, 5 }
  0x2f   : > { %s667_s19 = scalar_lea.hbm %s814_s1, %s343_s26  ;;  %s127_s22 = scalar_lea.vmem [#allocation5], %s328_s27 }
  0x30   : > { %s135_s23 = sshll.u32 %s127_s22, 4  ;;  %p669_p11 = pnand %p367_p6, %p56_p8  ;;  %s673_s23 = int_to_ptr.vmem [resolvable:$true] %s135_s23 }
  0x31   : > { %s675_s3 = scalar_lea.sflag [#allocation6], %s123_s20  ;;  %s435_s4 = scalar_lea.hbm %s667_s19, 512 }
  0x32   : > { %p436_p3 = scmp.ne.s32.totalorder %s667_s19, %s435_s4  ;;  %p437_p5 = pneg %p669_p11 }
  0x33   : > { %s440_s14 = scalar_lea.hbm %s814_s1, 1024  ;;  %p441_p12 = scmp.lt.u32.totalorder %s667_s19, %s814_s1 }
  0x34   : > { %p438_p7 = pnand %p437_p5, %p436_p3  ;;  %p442_p0 = scmp.lt.u32.totalorder %s440_s14, %s435_s4 }
  0x35   : > { %p444_p2 = scmp.lt.u32.totalorder %s435_s4, %s667_s19 }
  0x36   : > { %p439_p9 = pneg %p438_p7  ;;  %p443_p1 = por %p442_p0, %p441_p12 }
  0x38   : > { %p445_p4 = por %p444_p2, %p443_p1 }
  0x3a   : > { %p446_p6 = pnand %p445_p4, %p439_p9 }
  0x3c   : > { %449 = shalt.err (!%p446_p6)
}
  0x3d   : > { %s450_s20 = scalar_lea.vmem %s673_s23, 512  ;;  %s540_s27 = smov [#allocation5]  }
  0x3e   : > { %p451_p8 = scmp.ne.s32.totalorder %s673_s23, %s450_s20  ;;  %s455_s28 = sshll.u32 %s540_s27, 4  ;;  %s456_s28 = int_to_ptr.vmem [resolvable:$false] %s455_s28 }
  0x3f   : > { %s457_s29 = scalar_lea.vmem %s456_s28, 1024  ;;  %p458_p7 = scmp.lt.s32.totalorder %s673_s23, %s456_s28 }
  0x40   : > { %p453_p10 = pnand %p451_p8, %p437_p5  ;;  %p459_p12 = scmp.lt.s32.totalorder %s457_s29, %s450_s20 }
  0x42   : > { %p454_p3 = pneg %p453_p10  ;;  %p460_p0 = por %p459_p12, %p458_p7 }
  0x44   : > { %p461_p1 = pnand %p460_p0, %p454_p3 }
  0x46   : > { %464 = shalt.err (!%p461_p1)
}
  0x47   : > { %361 = dma.hbm_to_vmem [thread:$0]  (!%p669_p11), %s667_s19, 512, %s673_s23, %s675_s3, %s538_s7, %s538_s7, %s539_s8  }
  0x48   : > { %p826_p5 = scmp.ne.s32.totalorder %s821_s17, 0 }
  0x49   : > { %p827_p9 = scmp.eq.s32.totalorder (!%p826_p5), %s580_s13, 0 }
  0x4a   : > { %147 = sbr.rel (%p826_p5) target bundleno = 118 (0x76), region = 28 }
  0x51   : > { %510 = dma.done.wait (%p827_p9), [#allocation3], 1024   ;;  %p828_p2 = pmov %p827_p9 }
  0x52   : > { %s713_s22 = sand.u32 1, %s527_s10   ;;  %p829_p11 = scmp.ne.s32.totalorder %s819_s15, 0 }
  0x53   : > { %512 = vsyncadd (%p828_p2), [#allocation3], 4294966272  ;;  %s334_s30 = sshll.u32 %s713_s22, 5  ;;  %s154_s4 = scalar_lea.sflag [#allocation6], %s713_s22 }
  0x54   : > { %s717_s5 = scalar_lea.vmem [#allocation5], %s334_s30 }
  0x55   : > { %514 = dma.done.wait (%p829_p11), %s154_s4, 512  }
  0x56   : > { %516 = vsyncadd (%p829_p11), %s154_s4, 4294966784  ;;  %s335_s17 = sshll.u32 %s713_s22, 8  ;;  %s345_s7 = sshll.u32 %s580_s13, 12  ;;  %v180_v0 = vld [vmem:[#allocation2] sm:$0xff]  ;;  %v181_v2 = vld [vmem:[#allocation2 + $0x8] sm:$0xff] }
  0x57   : > { %s725_s8 = scalar_lea.vmem [#allocation7], %s335_s17  ;;  %v188_v1 = vld [vmem:[%s717_s5] sm:$0xff]  ;;  %v189_v3 = vld [vmem:[%s717_s5 + $0x8] sm:$0xff]  ;;  %v182_v4 = vld [vmem:[#allocation2 + $0x10] sm:$0xff]  ;;  %s741_s23 = scalar_lea.hbm %s815_s2, %s345_s7 }
  0x58   : > { %s239_s19 = sshll.u32 %s725_s8, 4  ;;  %192 = vst [vmem:[%s725_s8] sm:$0xff] %v180_v0  ;;  %208 = vst [vmem:[%s725_s8 + $0x80] sm:$0xff] %v180_v0  ;;  %v183_v5 = vld [vmem:[#allocation2 + $0x18] sm:$0xff]  ;;  %v184_v6 = vld [vmem:[#allocation2 + $0x20] sm:$0xff]  ;;  %s225_s3 = scalar_lea.sflag [#allocation4], %s713_s22  ;;  %s743_s19 = int_to_ptr.vmem [resolvable:$true] %s239_s19 }
  0x59   : > { %193 = vst [vmem:[%s725_s8 + $0x8] sm:$0xff] %v188_v1  ;;  %197 = vst [vmem:[%s725_s8 + $0x28] sm:$0xff] %v188_v1  ;;  %v185_v7 = vld [vmem:[#allocation2 + $0x28] sm:$0xff]  ;;  %v186_v8 = vld [vmem:[#allocation2 + $0x30] sm:$0xff]  ;;  %s465_s6 = scalar_lea.vmem %s743_s19, 4096  ;;  %s541_s14 = smov [#allocation7]  }
  0x5a   : > { %201 = vst [vmem:[%s725_s8 + $0x48] sm:$0xff] %v188_v1  ;;  %205 = vst [vmem:[%s725_s8 + $0x68] sm:$0xff] %v188_v1  ;;  %v187_v9 = vld [vmem:[#allocation2 + $0x38] sm:$0xff]  ;;  %v190_v10 = vld [vmem:[%s717_s5 + $0x10] sm:$0xff]  ;;  %p466_p4 = scmp.ne.s32.totalorder %s743_s19, %s465_s6  ;;  %s469_s18 = sshll.u32 %s541_s14, 4  ;;  %s470_s18 = int_to_ptr.vmem [resolvable:$false] %s469_s18 }
  0x5b   : > { %194 = vst [vmem:[%s725_s8 + $0x10] sm:$0xff] %v181_v2  ;;  %210 = vst [vmem:[%s725_s8 + $0x90] sm:$0xff] %v181_v2  ;;  %v191_v11 = vld [vmem:[%s717_s5 + $0x18] sm:$0xff]  ;;  %s471_s26 = scalar_lea.vmem %s470_s18, 8192  ;;  %p472_p10 = scmp.lt.s32.totalorder %s743_s19, %s470_s18 }
  0x5c   : > { %195 = vst [vmem:[%s725_s8 + $0x18] sm:$0xff] %v189_v3  ;;  %199 = vst [vmem:[%s725_s8 + $0x38] sm:$0xff] %v189_v3  ;;  %p467_p6 = pnand %p466_p4, %p658_p13  ;;  %p473_p3 = scmp.lt.s32.totalorder %s471_s26, %s465_s6 }
  0x5d   : > { %203 = vst [vmem:[%s725_s8 + $0x58] sm:$0xff] %v189_v3  ;;  %207 = vst [vmem:[%s725_s8 + $0x78] sm:$0xff] %v189_v3 }
  0x5e   : > { %196 = vst [vmem:[%s725_s8 + $0x20] sm:$0xff] %v182_v4  ;;  %212 = vst [vmem:[%s725_s8 + $0xa0] sm:$0xff] %v182_v4  ;;  %p468_p8 = pneg %p467_p6  ;;  %p474_p7 = por %p473_p3, %p472_p10 }
  0x5f   : > { %198 = vst [vmem:[%s725_s8 + $0x30] sm:$0xff] %v183_v5  ;;  %214 = vst [vmem:[%s725_s8 + $0xb0] sm:$0xff] %v183_v5 }
  0x60   : > { %200 = vst [vmem:[%s725_s8 + $0x40] sm:$0xff] %v184_v6  ;;  %216 = vst [vmem:[%s725_s8 + $0xc0] sm:$0xff] %v184_v6  ;;  %p475_p12 = pnand %p474_p7, %p468_p8 }
  0x61   : > { %202 = vst [vmem:[%s725_s8 + $0x50] sm:$0xff] %v185_v7  ;;  %218 = vst [vmem:[%s725_s8 + $0xd0] sm:$0xff] %v185_v7 }
  0x62   : > { %204 = vst [vmem:[%s725_s8 + $0x60] sm:$0xff] %v186_v8  ;;  %220 = vst [vmem:[%s725_s8 + $0xe0] sm:$0xff] %v186_v8 }
  0x63   : > { %206 = vst [vmem:[%s725_s8 + $0x70] sm:$0xff] %v187_v9  ;;  %222 = vst [vmem:[%s725_s8 + $0xf0] sm:$0xff] %v187_v9 }
  0x64   : > { %209 = vst [vmem:[%s725_s8 + $0x88] sm:$0xff] %v190_v10  ;;  %213 = vst [vmem:[%s725_s8 + $0xa8] sm:$0xff] %v190_v10 }
  0x65   : > { %217 = vst [vmem:[%s725_s8 + $0xc8] sm:$0xff] %v190_v10  ;;  %221 = vst [vmem:[%s725_s8 + $0xe8] sm:$0xff] %v190_v10 }
  0x66   : > { %211 = vst [vmem:[%s725_s8 + $0x98] sm:$0xff] %v191_v11  ;;  %215 = vst [vmem:[%s725_s8 + $0xb8] sm:$0xff] %v191_v11 }
  0x67   : > { %219 = vst [vmem:[%s725_s8 + $0xd8] sm:$0xff] %v191_v11  ;;  %223 = vst [vmem:[%s725_s8 + $0xf8] sm:$0xff] %v191_v11 }
  0x68   : > { %478 = shalt.err (!%p475_p12)
}
  0x69   : > { %s479_s20 = scalar_lea.hbm %s741_s23, 4096  ;;  %s483_s29 = scalar_lea.hbm %s815_s2, 8192 }
  0x6a   : > { %p480_p0 = scmp.ne.s32.totalorder %s741_s23, %s479_s20  ;;  %p484_p9 = scmp.lt.u32.totalorder %s741_s23, %s815_s2 }
  0x6b   : > { %p485_p2 = scmp.lt.u32.totalorder %s483_s29, %s479_s20  ;;  %p487_p4 = scmp.lt.u32.totalorder %s479_s20, %s741_s23 }
  0x6c   : > { %p481_p1 = pnand %p480_p0, %p658_p13 }
  0x6d   : > { %p486_p11 = por %p485_p2, %p484_p9 }
  0x6e   : > { %p482_p5 = pneg %p481_p1 }
  0x6f   : > { %p488_p6 = por %p487_p4, %p486_p11 }
  0x71   : > { %p489_p8 = pnand %p488_p6, %p482_p5 }
  0x73   : > { %492 = shalt.err (!%p489_p8)
}
  0x74   : > { %s542_s5 = smov 256   ;;  %s543_s17 = smov 16  }
  0x75   : > { %352 = dma.vmem_to_hbm [thread:$0]  (%p658_p13), %s743_s19, 4096, %s741_s23, %s225_s3, %s542_s5, %s542_s5, %s543_s17  }
  0x76 PF: > { %s254_s7 = sand.u32 1, %s523_s9   ;;  %p830_p10 = scmp.ne.s32.totalorder %s820_s16, 0 }
  0x77   : > { %p831_p3 = scmp.ge.s32.totalorder %s535_s12, 2  ;;  %s255_s8 = scalar_lea.sflag [#allocation4], %s254_s7 }
  0x79   : > { %p363_p7 = pnand %p831_p3, %p830_p10 }
  0x7b   : > { %518 = dma.done.wait (!%p363_p7), %s255_s8, 4096  }
  0x7c   : > { %520 = vsyncadd (!%p363_p7), %s255_s8, 4294963200  ;;  %p16_p12 = scmp.ge.s32.totalorder %s615_s21, 4   ;;  %s832_s9 = smov %s527_s10 }
  0x7d   : > { %s833_s10 = smov %s531_s11  ;;  %s834_s11 = smov %s654_s24 }
  0x7e   : > { %s835_s12 = smov %s615_s21  ;;  %18 = sbr.rel (!%p16_p12) target bundleno = 6 (0x6), region = 78 }
  0x85   :  { %260 = vsyncpa [#allocation3], 1 }
  0x86   :  { %262 = vsyncpa [#allocation3 + $0x1], 1 }
  0x87   :  { %263 = vsyncpa [#allocation6], 1 }
  0x88   :  { %265 = vsyncpa [#allocation6 + $0x1], 1 }
  0x89   :  { %266 = vsyncpa [#allocation4], 1 }
  0x8a   :  { %268 = vsyncpa [#allocation4 + $0x1], 1 }

</bundles_post_ra>
